<compile_context>
chip_gen: v6e
topology: v6e:2x2x1
jax: 0.10.0
libtpu: 0.0.40
codegen_flags: <defaults>
</compile_context>

<pallas_src>
import functools
import math

import jax
import jax.numpy as jnp
from jax import lax
from jax.experimental import pallas as pl
from jax.experimental.pallas import tpu as pltpu


def _round_up(n, m):
    return ((n + m - 1) // m) * m


def _ls_cross_kernel(x_ref, t_ref, out_ref, *, confidence, off_value):
    # x_ref: (TM, C) log-probs; t_ref: (TM, 1) int32 class ids.
    x = x_ref[...].astype(jnp.float32)
    tgt = t_ref[...]
    col = lax.broadcasted_iota(jnp.int32, x.shape, 1)
    w = jnp.where(col == tgt, jnp.float32(confidence), jnp.float32(off_value))
    # One fused weighted row reduction; zero-padded rows give exactly 0.
    out_ref[...] = jnp.sum(w * x, axis=-1, keepdims=True)


def label_smoothing_v2(x, target, smoothing=0.0, *, block_rows=None,
                       tile_budget_bytes=4 << 20):
    """x: (N, C) log-probabilities (f32 or bf16); target: (N,) int class ids.

    Returns the scalar KLDivLoss(size_average=False) against the smoothed
    distribution, exactly like the PyTorch module's forward.
    """
    N, C = x.shape
    confidence = 1.0 - smoothing
    off_value = (smoothing / (C - 1)) if C > 1 else 0.0

    itemsize = jnp.dtype(x.dtype).itemsize
    if block_rows is None:
        # Mem-bound kernel: make the x tile ~tile_budget_bytes (it gets
        # double-buffered by the pipeline), multiple of 8 sublanes, <=1024.
        block_rows = tile_budget_bytes // max(C * itemsize, 1)
        block_rows = min(max(block_rows, 8), 1024)
    block_rows = max(8, (int(block_rows) // 8) * 8)
    block_rows = min(block_rows, _round_up(N, 8))

    n_pad = _round_up(N, block_rows)
    num_blocks = n_pad // block_rows

    tgt2d = target.astype(jnp.int32).reshape(N, 1)
    if n_pad != N:
        # Zero-padded rows contribute 0 to the cross term (x == 0 there).
        x = jnp.pad(x, ((0, n_pad - N), (0, 0)))
        tgt2d = jnp.pad(tgt2d, ((0, n_pad - N), (0, 0)))

    # VMEM budget: double-buffered x tile + target tile + per-row output.
    need = 2 * block_rows * C * itemsize + 4 * block_rows * 4 + (1 << 20)
    vmem_limit = int(min(max(need, 16 << 20), 48 << 20))

    kernel = functools.partial(
        _ls_cross_kernel,
        confidence=float(confidence),
        off_value=float(off_value),
    )

    cross = pl.pallas_call(
        kernel,
        out_shape=jax.ShapeDtypeStruct((n_pad, 1), jnp.float32),
        grid_spec=pltpu.PrefetchScalarGridSpec(
            num_scalar_prefetch=0,
            grid=(num_blocks,),
            in_specs=[
                pl.BlockSpec((block_rows, C), lambda i: (i, 0)),
                pl.BlockSpec((block_rows, 1), lambda i: (i, 0)),
            ],
            out_specs=pl.BlockSpec((block_rows, 1), lambda i: (i, 0)),
        ),
        compiler_params=pltpu.CompilerParams(
            dimension_semantics=("parallel",),
            vmem_limit_bytes=vmem_limit,
        ),
    )(x, tgt2d)

    # x-independent entropy term of KLDiv (PyTorch convention 0*log(0) == 0).
    ent = 0.0
    if confidence > 0.0:
        ent += confidence * math.log(confidence)
    if smoothing > 0.0 and C > 1:
        ent += smoothing * math.log(smoothing / (C - 1))

    return jnp.float32(N * ent) - jnp.sum(cross)


def _reference(x, target, smoothing):
    """Literal port of the PyTorch module: KLDivLoss(size_average=False)."""
    N, C = x.shape
    confidence = 1.0 - smoothing
    off = smoothing / (C - 1)
    onehot = jax.nn.one_hot(target, C, dtype=jnp.float32)
    true_dist = off * (1.0 - onehot) + confidence * onehot
    xf = x.astype(jnp.float32)
    return jnp.sum(jax.scipy.special.xlogy(true_dist, true_dist) - true_dist * xf)


if __name__ == "__main__":
    key = jax.random.PRNGKey(0)
    kx, kt = jax.random.split(key)

    N, C = 20, 384
    smoothing = 0.1
    logits = jax.random.normal(kx, (N, C), dtype=jnp.float32)
    x = jax.nn.log_softmax(logits, axis=-1)      # module expects log-probs
    target = jax.random.randint(kt, (N,), 0, C, dtype=jnp.int32)

    ref = _reference(x, target, smoothing)

    # Auto-tiled (single large block) path.
    loss = jax.block_until_ready(label_smoothing_v2(x, target, smoothing=smoothing))
    assert jnp.allclose(loss, ref, rtol=1e-4, atol=1e-4), (loss, ref)

    # Multi-block path with row padding (N=20 -> 24, grid=3).
    loss_small = jax.block_until_ready(
        label_smoothing_v2(x, target, smoothing=smoothing, block_rows=8))
    assert jnp.allclose(loss_small, ref, rtol=1e-4, atol=1e-4), (loss_small, ref)

    # bf16 logits (halves HBM traffic); kernel still computes in f32.
    x_bf16 = x.astype(jnp.bfloat16)
    ref_bf16 = _reference(x_bf16, target, smoothing)
    loss_bf16 = jax.block_until_ready(
        label_smoothing_v2(x_bf16, target, smoothing=smoothing))
    assert jnp.allclose(loss_bf16, ref_bf16, rtol=1e-3, atol=1e-3), (loss_bf16, ref_bf16)

    print("KERNEL_OK")
</pallas_src>

<mosaic_0001>
module attributes {stable_mosaic.version = 11 : i64} {
  func.func @_ls_cross_kernel(%arg0: i32, %arg1: memref<24x384xf32, #tpu.memory_space<vmem>>, %arg2: memref<24x1xi32, #tpu.memory_space<vmem>>, %arg3: memref<24x1xf32, #tpu.memory_space<vmem>>) attributes {dimension_semantics = [#tpu.dimension_semantics<parallel>], iteration_bounds = array<i64: 1>, scalar_prefetch = 0 : i64, scratch_operands = 0 : i64, tpu.core_type = #tpu.core_type<tc>, window_params = [{transform_indices = @transform_0, window_bounds = array<i64: 24, 384>}, {transform_indices = @transform_1, window_bounds = array<i64: 24, 1>}, {transform_indices = @transform_2, window_bounds = array<i64: 24, 1>}]} {
    %c0 = arith.constant 0 : index
    %c0_0 = arith.constant 0 : index
    %0 = vector.load %arg1[%c0, %c0_0] : memref<24x384xf32, #tpu.memory_space<vmem>>, vector<24x384xf32>
    %c0_1 = arith.constant 0 : index
    %c0_2 = arith.constant 0 : index
    %1 = vector.load %arg2[%c0_1, %c0_2] : memref<24x1xi32, #tpu.memory_space<vmem>>, vector<24x1xi32>
    %2 = tpu.iota {dimensions = array<i32: 1>} : vector<24x384xi32>
    %3 = vector.broadcast %1 : vector<24x1xi32> to vector<24x384xi32>
    %4 = arith.cmpi eq, %2, %3 : vector<24x384xi32>
    %cst = arith.constant 0.899999976 : f32
    %cst_3 = arith.constant 2.61096604E-4 : f32
    %5 = vector.broadcast %cst : f32 to vector<24x384xf32>
    %6 = vector.broadcast %cst_3 : f32 to vector<24x384xf32>
    %7 = arith.select %4, %5, %6 : vector<24x384xi1>, vector<24x384xf32>
    %8 = arith.mulf %7, %0 : vector<24x384xf32>
    %cst_4 = arith.constant dense<0.000000e+00> : vector<24xf32>
    %9 = vector.multi_reduction <add>, %8, %cst_4 [1] : vector<24x384xf32> to vector<24xf32>
    %10 = vector.shape_cast %9 : vector<24xf32> to vector<24x1xf32>
    %c0_5 = arith.constant 0 : index
    %c0_6 = arith.constant 0 : index
    %11 = vector.load %arg3[%c0_5, %c0_6] : memref<24x1xf32, #tpu.memory_space<vmem>>, vector<24x1xf32>
    tpu.vector_store %arg3[%c0_5, %c0_6], %10 {strides = array<i32>} : memref<24x1xf32, #tpu.memory_space<vmem>>, vector<24x1xf32>,
    return
  }
  func.func @transform_0(%arg0: i32) -> (i32, i32) {
    %c0_i32 = arith.constant 0 : i32
    %c0_i32_0 = arith.constant 0 : i32
    return %arg0, %c0_i32 : i32, i32
  }
  func.func @transform_1(%arg0: i32) -> (i32, i32) {
    %c0_i32 = arith.constant 0 : i32
    %c0_i32_0 = arith.constant 0 : i32
    return %arg0, %c0_i32 : i32, i32
  }
  func.func @transform_2(%arg0: i32) -> (i32, i32) {
    %c0_i32 = arith.constant 0 : i32
    %c0_i32_0 = arith.constant 0 : i32
    return %arg0, %c0_i32 : i32, i32
  }
}

</mosaic_0001>

<bundles_post_ra>
// kernel: tpu_custom_call.1
= control target key start
LH: loop header
LB: loop body
LE: loop exit
PB: predicated region body
PF: predicated region fallthrough
CT: control target
= control target key end

     0   :  { %7 = vsyncpa [#allocation3], 0  ;;  %s127_s9 = smov [#allocation2]   ;;  %s169_s0 = inlined_call_operand.hbm [shape: f32[24,384], index: 0, kind: input, shape index: {}]   ;;  %s170_s1 = inlined_call_operand.vmem [shape: s32[24,1], index: 1, kind: input, shape index: {}]   ;;  %s171_s2 = inlined_call_operand.vmem [shape: f32[24,1], index: 2, kind: output, shape index: {}]  }
   0x1   :  { %s13_s10 = sshll.u32 %s127_s9, 4  ;;  %s14_s10 = int_to_ptr.vmem [resolvable:$true] %s13_s10 }
   0x2   :  { %s113_s11 = scalar_lea.vmem %s14_s10, 1152  ;;  %p118_p1 = scmp.lt.s32.totalorder %s14_s10, %s14_s10 }
   0x3   :  { %p114_p0 = scmp.ne.s32.totalorder %s14_s10, %s113_s11  ;;  %p119_p2 = scmp.lt.s32.totalorder %s113_s11, %s113_s11 }
   0x5   :  { %p120_p3 = por %p119_p2, %p118_p1 }
   0x7   :  { %p121_p4 = pnand %p120_p3, %p114_p0 }
   0x9   :  { %124 = shalt.err (!%p121_p4)
}
   0xa   :  { %s128_s12 = smov 384   ;;  %s129_s13 = smov 24  }
   0xb   :  { %19 = dma.hbm_to_vmem [thread:$0]  %s169_s0, 1152, %s14_s10, [#allocation3], %s128_s12, %s128_s12, %s129_s13  }
   0xc   :  { %125 = dma.done.wait [#allocation3], 1152  }
   0xd   :  { %126 = vsyncadd [#allocation3], 4294966144  ;;  %v130_v0 = vmov 0   ;;  %v34_v1 = vld [vmem:[%s170_s1] sm:$0xff]  ;;  %v36_v2 = vld [vmem:[%s170_s1 + $0x10] sm:$0xff]  ;;  %v37_v4 = vlaneseq  ;;  %vm89_vm9 = vcmask 7168  }
   0xe   :  { %103 = vset.pattern.permute.xlu0 %v130_v0  ;;  %104 = vset.pattern.permute.xlu1 %v130_v0  ;;  %v35_v3 = vld [vmem:[%s170_s1 + $0x8] sm:$0xff]  ;;  %v25_v10 = vld [vmem:[#allocation2] sm:$0xff]  ;;  %v131_v12 = vmov 0.0002610966   ;;  %v27_v15 = vld [vmem:[#allocation2 + $0x10] sm:$0xff] }
   0xf   :  { %42 = vperm.xlu0 %103, %v34_v1   ;;  %48 = vperm.xlu1 %104, %v36_v2   ;;  %v38_v5 = vand.u32 127, %v37_v4  ;;  %v26_v11 = vld [vmem:[#allocation2 + $0x8] sm:$0xff]  ;;  %v28_v18 = vld [vmem:[#allocation2 + $0x18] sm:$0xff]  ;;  %v29_v19 = vld [vmem:[#allocation2 + $0x20] sm:$0xff] }
  0x10   :  { %v31_v24 = vld [vmem:[#allocation2 + $0x30] sm:$0xff]  ;;  %v32_v25 = vld [vmem:[#allocation2 + $0x38] sm:$0xff]  ;;  %v30_v27 = vld [vmem:[#allocation2 + $0x28] sm:$0xff] }
  0x11   :  { %v39_v6 = vadd.s32 128, %v38_v5  ;;  %v40_v7 = vadd.s32 256, %v38_v5  ;;  %v33_v37 = vld [vmem:[#allocation2 + $0x40] sm:$0xff] }
  0x13   :  { %45 = vperm.xlu0 %103, %v35_v3  }
  0x8a   :  { %v43_v8 = vpop.permute.xlu0 %42  ;;  %v49_v9 = vpop.permute.xlu1 %48 }
  0x8b   :  { %vm50_vm0 = vcmp.eq.s32.totalorder %v38_v5, %v43_v8  ;;  %vm51_vm1 = vcmp.eq.s32.totalorder %v39_v6, %v43_v8  ;;  %vm52_vm2 = vcmp.eq.s32.totalorder %v40_v7, %v43_v8  ;;  %vm56_vm3 = vcmp.eq.s32.totalorder %v38_v5, %v49_v9 }
  0x8c   :  { %v59_v13 = vsel %vm50_vm0, 0.9, %v131_v12  ;;  %v60_v14 = vsel %vm51_vm1, 0.9, %v131_v12  ;;  %vm57_vm4 = vcmp.eq.s32.totalorder %v39_v6, %v49_v9  ;;  %v61_v16 = vsel %vm52_vm2, 0.9, %v131_v12 }
  0x8d   :  { %v68_v17 = vmul.f32 %v59_v13, %v25_v10  ;;  %vm58_vm5 = vcmp.eq.s32.totalorder %v40_v7, %v49_v9  ;;  %v65_v21 = vsel %vm56_vm3, 0.9, %v131_v12  ;;  %v66_v22 = vsel %vm57_vm4, 0.9, %v131_v12 }
  0x8e   :  { %v46_v20 = vpop.permute.xlu0 %45  ;;  %v69_v23 = vmul.f32 %v60_v14, %v26_v11  ;;  %v70_v26 = vmul.f32 %v61_v16, %v27_v15  ;;  %v74_v34 = vmul.f32 %v65_v21, %v31_v24  ;;  %v75_v35 = vmul.f32 %v66_v22, %v32_v25 }
  0x8f   :  { %vm53_vm6 = vcmp.eq.s32.totalorder %v38_v5, %v46_v20  ;;  %vm54_vm7 = vcmp.eq.s32.totalorder %v39_v6, %v46_v20  ;;  %vm55_vm8 = vcmp.eq.s32.totalorder %v40_v7, %v46_v20  ;;  %v67_v38 = vsel %vm58_vm5, 0.9, %v131_v12 }
  0x90   :  { %v62_v28 = vsel %vm53_vm6, 0.9, %v131_v12  ;;  %v63_v29 = vsel %vm54_vm7, 0.9, %v131_v12  ;;  %v77_v30 = vadd.f32 %v69_v23, %v68_v17  ;;  %v64_v31 = vsel %vm55_vm8, 0.9, %v131_v12 }
  0x91   :  { %v71_v32 = vmul.f32 %v62_v28, %v28_v18  ;;  %v72_v33 = vmul.f32 %v63_v29, %v29_v19  ;;  %v73_v39 = vmul.f32 %v64_v31, %v30_v27  ;;  %v76_v42 = vmul.f32 %v67_v38, %v33_v37 }
  0x92   :  { %v78_v36 = vadd.f32 %v77_v30, %v70_v26  ;;  %v85_v43 = vadd.f32 %v75_v35, %v74_v34 }
  0x93   :  { %v81_v40 = vadd.f32 %v72_v33, %v71_v32 }
  0x94   :  { %79 = vadd.xlane.f32.xlu1 %v78_v36  ;;  %v86_v44 = vadd.f32 %v85_v43, %v76_v42 }
  0x95   :  { %v82_v41 = vadd.f32 %v81_v40, %v73_v39 }
  0x97   :  { %83 = vadd.xlane.f32.xlu0 %v82_v41 }
  0x9b   :  { %87 = vadd.xlane.f32.xlu0 %v86_v44 }
 0x11d   :  { %v80_v45 = vpop.xlane.xlu1 %79 }
 0x11e   :  { %90 = vst.msk [vmem:[%s171_s2] sm:$0xff] %vm89_vm9, %v80_v45 }
 0x120   :  { %v84_v46 = vpop.xlane.xlu0 %83 }
 0x121   :  { %91 = vst.msk [vmem:[%s171_s2 + $0x8] sm:$0xff] %vm89_vm9, %v84_v46 }
 0x124   :  { %v88_v47 = vpop.xlane.xlu0 %87 }
 0x125   :  { %92 = vst.msk [vmem:[%s171_s2 + $0x10] sm:$0xff] %vm89_vm9, %v88_v47 }
 0x126   :  { %97 = vsyncpa [#allocation3], 1 }

</bundles_post_ra>
